<compile_context>
chip_gen: v5e
topology: v5e:2x2
jax: 0.10.0
libtpu: 0.0.40
codegen_flags: <defaults>
</compile_context>

<pallas_src>
import functools

import jax
import jax.numpy as jnp
from jax import lax
from jax.experimental import pallas as pl
from jax.experimental.pallas import tpu as pltpu

_COS_EPS = 1e-8      # torch F.cosine_similarity default eps
_CLAMP_MIN = 1e-6    # clamp(min=1e-06) in the module
_EPS_SQ = _COS_EPS * _COS_EPS


def _round_up(x, m):
    return ((x + m - 1) // m) * m


def _triplet_cos_loss_kernel(r_ref, g_ref, b_ref, out_ref, *, margin, n_rows, tile_n):
    """One batch tile: per-row cosine-triplet term, masked, partial-summed."""
    i = pl.program_id(0)

    r = r_ref[...].astype(jnp.float32)   # (tile_n, D)
    g = g_ref[...].astype(jnp.float32)
    b = b_ref[...].astype(jnp.float32)

    # Row-wise dot products and squared norms (lane-axis reductions).
    dot_rg = jnp.sum(r * g, axis=1, keepdims=True)   # (tile_n, 1)
    dot_rb = jnp.sum(r * b, axis=1, keepdims=True)
    rr = jnp.sum(r * r, axis=1, keepdims=True)
    gg = jnp.sum(g * g, axis=1, keepdims=True)
    bb = jnp.sum(b * b, axis=1, keepdims=True)

    # 1 / max(||x||, eps) == rsqrt(max(||x||^2, eps^2))  -- EUP, no divides.
    inv_r = lax.rsqrt(jnp.maximum(rr, _EPS_SQ))
    inv_g = lax.rsqrt(jnp.maximum(gg, _EPS_SQ))
    inv_b = lax.rsqrt(jnp.maximum(bb, _EPS_SQ))

    good_sim = dot_rg * inv_r * inv_g                 # (tile_n, 1)
    bad_sim = dot_rb * inv_r * inv_b

    per_row = jnp.maximum(margin - (good_sim - bad_sim), _CLAMP_MIN)

    # Mask rows of the (possibly padded) last tile out of the sum.
    row_idx = i * tile_n + lax.broadcasted_iota(jnp.int32, per_row.shape, 0)
    per_row = jnp.where(row_idx < n_rows, per_row, 0.0)

    # Partial sum for this tile; mean is finished (divide by N) in the wrapper.
    out_ref[...] = jnp.sum(per_row).reshape(1, 1, 1)


def triplet_cos_loss(repr_, good, bad, margin, *, tile_n=None,
                     vmem_budget_bytes=16 << 20):
    """Pallas TPU implementation of Triplet_COS_Loss.forward. Inputs: (N, D)."""
    assert repr_.shape == good.shape == bad.shape
    n, d = repr_.shape
    itemsize = jnp.dtype(repr_.dtype).itemsize

    if tile_n is None:
        # 3 inputs x 2 pipeline buffers per tile must fit the VMEM budget.
        t = vmem_budget_bytes // (3 * 2 * d * itemsize)
        t = max(8, min(int(t), 2048))
        t = (t // 8) * 8
        tile_n = min(t, _round_up(n, 8))
    assert tile_n % 8 == 0, "tile_n must be a multiple of 8 sublanes"

    num_tiles = pl.cdiv(n, tile_n)
    kernel = functools.partial(
        _triplet_cos_loss_kernel, margin=float(margin), n_rows=n, tile_n=tile_n
    )

    in_spec = pl.BlockSpec((tile_n, d), lambda i: (i, 0))
    # Per-tile scalar partials; trailing (1, 1) dims equal the full array dims,
    # tile index lives on the leading axis.
    out_spec = pl.BlockSpec((1, 1, 1), lambda i: (i, 0, 0))

    partials = pl.pallas_call(
        kernel,
        out_shape=jax.ShapeDtypeStruct((num_tiles, 1, 1), jnp.float32),
        grid=(num_tiles,),
        in_specs=[in_spec, in_spec, in_spec],
        out_specs=out_spec,
        compiler_params=pltpu.CompilerParams(
            dimension_semantics=("parallel",),   # tiles are independent -> megacore OK
            vmem_limit_bytes=32 << 20,
        ),
    )(repr_, good, bad)

    return jnp.sum(partials) / n


def _reference(repr_, good, bad, margin):
    def cos(a, b):
        dot = jnp.sum(a * b, axis=1)
        na = jnp.maximum(jnp.linalg.norm(a, axis=1), _COS_EPS)
        nb = jnp.maximum(jnp.linalg.norm(b, axis=1), _COS_EPS)
        return dot / (na * nb)

    good_sim = cos(repr_, good)
    bad_sim = cos(repr_, bad)
    return jnp.mean(jnp.maximum(margin - (good_sim - bad_sim), _CLAMP_MIN))


if __name__ == "__main__":
    key = jax.random.PRNGKey(0)
    margin = 0.5

    # Case 1: small batch of embeddings (batch=8, hidden=32), single tile.
    k1, k2, k3, k4, k5, k6 = jax.random.split(key, 6)
    N, D = 8, 32
    repr_ = jax.random.normal(k1, (N, D), dtype=jnp.float32)
    good = jax.random.normal(k2, (N, D), dtype=jnp.float32)
    bad = jax.random.normal(k3, (N, D), dtype=jnp.float32)

    loss = jax.block_until_ready(triplet_cos_loss(repr_, good, bad, margin))
    ref = jax.block_until_ready(_reference(repr_, good, bad, margin))
    assert jnp.allclose(loss, ref, rtol=1e-5, atol=1e-6), (loss, ref)

    # Case 2: multi-tile grid with a ragged remainder tile (exercises masking).
    N2, D2 = 20, 64
    repr2 = jax.random.normal(k4, (N2, D2), dtype=jnp.float32)
    good2 = jax.random.normal(k5, (N2, D2), dtype=jnp.float32)
    bad2 = jax.random.normal(k6, (N2, D2), dtype=jnp.float32)

    loss2 = jax.block_until_ready(
        triplet_cos_loss(repr2, good2, bad2, margin, tile_n=8)
    )
    ref2 = jax.block_until_ready(_reference(repr2, good2, bad2, margin))
    assert jnp.allclose(loss2, ref2, rtol=1e-5, atol=1e-6), (loss2, ref2)

    print("KERNEL_OK")
</pallas_src>

<mosaic_0001>
module attributes {stable_mosaic.version = 11 : i64} {
  func.func @_triplet_cos_loss_kernel(%arg0: i32, %arg1: memref<8x32xf32, #tpu.memory_space<vmem>>, %arg2: memref<8x32xf32, #tpu.memory_space<vmem>>, %arg3: memref<8x32xf32, #tpu.memory_space<vmem>>, %arg4: memref<1x1x1xf32, #tpu.memory_space<vmem>>) attributes {dimension_semantics = [#tpu.dimension_semantics<parallel>], iteration_bounds = array<i64: 1>, scalar_prefetch = 0 : i64, scratch_operands = 0 : i64, tpu.core_type = #tpu.core_type<tc>, window_params = [{transform_indices = @transform_0, window_bounds = array<i64: 8, 32>}, {transform_indices = @transform_1, window_bounds = array<i64: 8, 32>}, {transform_indices = @transform_2, window_bounds = array<i64: 8, 32>}, {transform_indices = @transform_3, window_bounds = array<i64: 1, 1, 1>}]} {
    %c0 = arith.constant 0 : index
    %c0_0 = arith.constant 0 : index
    %0 = vector.load %arg1[%c0, %c0_0] : memref<8x32xf32, #tpu.memory_space<vmem>>, vector<8x32xf32>
    %c0_1 = arith.constant 0 : index
    %c0_2 = arith.constant 0 : index
    %1 = vector.load %arg2[%c0_1, %c0_2] : memref<8x32xf32, #tpu.memory_space<vmem>>, vector<8x32xf32>
    %c0_3 = arith.constant 0 : index
    %c0_4 = arith.constant 0 : index
    %2 = vector.load %arg3[%c0_3, %c0_4] : memref<8x32xf32, #tpu.memory_space<vmem>>, vector<8x32xf32>
    %3 = arith.mulf %0, %1 : vector<8x32xf32>
    %cst = arith.constant dense<0.000000e+00> : vector<8xf32>
    %4 = vector.multi_reduction <add>, %3, %cst [1] : vector<8x32xf32> to vector<8xf32>
    %5 = vector.shape_cast %4 : vector<8xf32> to vector<8x1xf32>
    %6 = arith.mulf %0, %2 : vector<8x32xf32>
    %cst_5 = arith.constant dense<0.000000e+00> : vector<8xf32>
    %7 = vector.multi_reduction <add>, %6, %cst_5 [1] : vector<8x32xf32> to vector<8xf32>
    %8 = vector.shape_cast %7 : vector<8xf32> to vector<8x1xf32>
    %9 = arith.mulf %0, %0 : vector<8x32xf32>
    %cst_6 = arith.constant dense<0.000000e+00> : vector<8xf32>
    %10 = vector.multi_reduction <add>, %9, %cst_6 [1] : vector<8x32xf32> to vector<8xf32>
    %11 = vector.shape_cast %10 : vector<8xf32> to vector<8x1xf32>
    %12 = arith.mulf %1, %1 : vector<8x32xf32>
    %cst_7 = arith.constant dense<0.000000e+00> : vector<8xf32>
    %13 = vector.multi_reduction <add>, %12, %cst_7 [1] : vector<8x32xf32> to vector<8xf32>
    %14 = vector.shape_cast %13 : vector<8xf32> to vector<8x1xf32>
    %15 = arith.mulf %2, %2 : vector<8x32xf32>
    %cst_8 = arith.constant dense<0.000000e+00> : vector<8xf32>
    %16 = vector.multi_reduction <add>, %15, %cst_8 [1] : vector<8x32xf32> to vector<8xf32>
    %17 = vector.shape_cast %16 : vector<8xf32> to vector<8x1xf32>
    %cst_9 = arith.constant 1.000000e-16 : f32
    %18 = vector.broadcast %cst_9 : f32 to vector<8x1xf32>
    %19 = arith.maximumf %11, %18 : vector<8x1xf32>
    %20 = math.rsqrt %19 : vector<8x1xf32>
    %cst_10 = arith.constant 1.000000e-16 : f32
    %21 = vector.broadcast %cst_10 : f32 to vector<8x1xf32>
    %22 = arith.maximumf %14, %21 : vector<8x1xf32>
    %23 = math.rsqrt %22 : vector<8x1xf32>
    %cst_11 = arith.constant 1.000000e-16 : f32
    %24 = vector.broadcast %cst_11 : f32 to vector<8x1xf32>
    %25 = arith.maximumf %17, %24 : vector<8x1xf32>
    %26 = math.rsqrt %25 : vector<8x1xf32>
    %27 = arith.mulf %5, %20 : vector<8x1xf32>
    %28 = arith.mulf %27, %23 : vector<8x1xf32>
    %29 = arith.mulf %8, %20 : vector<8x1xf32>
    %30 = arith.mulf %29, %26 : vector<8x1xf32>
    %31 = arith.subf %28, %30 : vector<8x1xf32>
    %cst_12 = arith.constant 5.000000e-01 : f32
    %32 = vector.broadcast %cst_12 : f32 to vector<8x1xf32>
    %33 = arith.subf %32, %31 : vector<8x1xf32>
    %cst_13 = arith.constant 9.99999997E-7 : f32
    %34 = vector.broadcast %cst_13 : f32 to vector<8x1xf32>
    %35 = arith.maximumf %33, %34 : vector<8x1xf32>
    %c8_i32 = arith.constant 8 : i32
    %36 = arith.muli %arg0, %c8_i32 : i32
    %37 = tpu.iota {dimensions = array<i32: 0>} : vector<8x1xi32>
    %38 = vector.broadcast %36 : i32 to vector<8x1xi32>
    %39 = arith.addi %38, %37 : vector<8x1xi32>
    %c8_i32_14 = arith.constant 8 : i32
    %40 = vector.broadcast %c8_i32_14 : i32 to vector<8x1xi32>
    %41 = arith.cmpi slt, %39, %40 : vector<8x1xi32>
    %cst_15 = arith.constant 0.000000e+00 : f32
    %42 = vector.broadcast %cst_15 : f32 to vector<8x1xf32>
    %43 = arith.select %41, %35, %42 : vector<8x1xi1>, vector<8x1xf32>
    %44 = vector.shape_cast %43 : vector<8x1xf32> to vector<1x8x1xf32>
    %cst_16 = arith.constant dense<0.000000e+00> : vector<1xf32>
    %45 = vector.multi_reduction <add>, %44, %cst_16 [1, 2] : vector<1x8x1xf32> to vector<1xf32>
    %46 = vector.shape_cast %45 : vector<1xf32> to vector<1x1x1xf32>
    %47 = vector.extract %46[0, 0, 0] : f32 from vector<1x1x1xf32>
    %48 = vector.broadcast %47 : f32 to vector<1x1x1xf32>
    %c0_17 = arith.constant 0 : index
    %c0_18 = arith.constant 0 : index
    %c0_19 = arith.constant 0 : index
    %49 = vector.load %arg4[%c0_17, %c0_18, %c0_19] : memref<1x1x1xf32, #tpu.memory_space<vmem>>, vector<1x1x1xf32>
    tpu.vector_store %arg4[%c0_17, %c0_18, %c0_19], %48 {strides = array<i32>} : memref<1x1x1xf32, #tpu.memory_space<vmem>>, vector<1x1x1xf32>,
    return
  }
  func.func @transform_0(%arg0: i32) -> (i32, i32) {
    %c0_i32 = arith.constant 0 : i32
    %c0_i32_0 = arith.constant 0 : i32
    return %arg0, %c0_i32 : i32, i32
  }
  func.func @transform_1(%arg0: i32) -> (i32, i32) {
    %c0_i32 = arith.constant 0 : i32
    %c0_i32_0 = arith.constant 0 : i32
    return %arg0, %c0_i32 : i32, i32
  }
  func.func @transform_2(%arg0: i32) -> (i32, i32) {
    %c0_i32 = arith.constant 0 : i32
    %c0_i32_0 = arith.constant 0 : i32
    return %arg0, %c0_i32 : i32, i32
  }
  func.func @transform_3(%arg0: i32) -> (i32, i32, i32) {
    %c0_i32 = arith.constant 0 : i32
    %c0_i32_0 = arith.constant 0 : i32
    %c0_i32_1 = arith.constant 0 : i32
    return %arg0, %c0_i32, %c0_i32_0 : i32, i32, i32
  }
}

</mosaic_0001>

<bundles_post_ra>
// kernel: tpu_custom_call.1
= control target key start
LH: loop header
LB: loop body
LE: loop exit
PB: predicated region body
PF: predicated region fallthrough
CT: control target
= control target key end

     0   :  { %8 = vsyncpa [#allocation3], 0  ;;  %s309_s0 = inlined_call_operand.hbm [shape: f32[8,32], index: 0, kind: input, shape index: {}]   ;;  %s310_s1 = inlined_call_operand.hbm [shape: f32[8,32], index: 1, kind: input, shape index: {}]   ;;  %s311_s2 = inlined_call_operand.hbm [shape: f32[8,32], index: 2, kind: input, shape index: {}]   ;;  %s312_s3 = inlined_call_operand.hbm [shape: f32[1,1,1], index: 3, kind: output, shape index: {}]  }
   0x1   :  { %9 = vsyncpa [#allocation6], 0  ;;  %s27_s14 = sshll.u32 %s310_s1, 4  ;;  %s28_s14 = int_to_ptr.hbm [resolvable:$true] %s27_s14 }
   0x2   :  { %10 = vsyncpa [#allocation4], 0  ;;  %s273_s15 = smov [#allocation5]   ;;  %s16_s19 = sshll.u32 %s309_s0, 4  ;;  %s17_s19 = int_to_ptr.hbm [resolvable:$true] %s16_s19 }
   0x3   :  { %s29_s16 = sshll.u32 %s273_s15, 4  ;;  %s274_s20 = smov [#allocation2]   ;;  %s30_s16 = int_to_ptr.vmem [resolvable:$true] %s29_s16 }
   0x4   :  { %32 = dma.hbm_to_vmem [thread:$0]  %s28_s14, 128, %s30_s16, [#allocation6]  }
   0x5   :  { %s18_s21 = sshll.u32 %s274_s20, 4  ;;  %s38_s24 = sshll.u32 %s311_s2, 4  ;;  %s19_s21 = int_to_ptr.vmem [resolvable:$true] %s18_s21  ;;  %s39_s24 = int_to_ptr.hbm [resolvable:$true] %s38_s24 }
   0x6   :  { %21 = dma.hbm_to_vmem [thread:$0]  %s17_s19, 128, %s19_s21, [#allocation3]  }
   0x7   :  { %s275_s1 = smov [#allocation7]  }
   0x8   :  { %s40_s25 = sshll.u32 %s275_s1, 4  ;;  %s41_s25 = int_to_ptr.vmem [resolvable:$true] %s40_s25 }
   0x9   :  { %43 = dma.hbm_to_vmem [thread:$0]  %s39_s24, 128, %s41_s25, [#allocation6]  }
   0xa   :  { %267 = dma.done.wait [#allocation3], 128  }
   0xb   :  { %268 = vsyncadd [#allocation3], 4294967168 }
   0xc   :  { %269 = dma.done.wait [#allocation6], 256  }
   0xd   :  { %270 = vsyncadd [#allocation6], 4294967040  ;;  %v58_v0 = vld [vmem:[#allocation7] sm:$0xff]  ;;  %vm60_vm0 = vcmask 261120   ;;  %v56_v1 = vld [vmem:[#allocation2] sm:$0xff]  ;;  %vm127_vm10 = vcmask 7168  }
   0xe   :  { %v76_v2 = vmul.f32 %v58_v0, %v58_v0  ;;  %v68_v3 = vmul.f32 %v56_v1, %v56_v1  ;;  %v64_v4 = vmul.f32 %v58_v0, %v56_v1  ;;  %v57_v5 = vld [vmem:[#allocation5] sm:$0xff]  ;;  %s276_s0 = smov [#allocation8]   ;;  %s148_s28 = sshll.u32 %s312_s3, 4  ;;  %vm139_vm11 = vcmask 0   ;;  %s149_s28 = int_to_ptr.hbm [resolvable:$true] %s148_s28 }
   0xf   :  { %v72_v9 = vmul.f32 %v57_v5, %v57_v5  ;;  %v59_v10 = vmul.f32 %v57_v5, %v56_v1  ;;  %s146_s2 = sshll.u32 %s276_s0, 4  ;;  %s147_s2 = int_to_ptr.vmem [resolvable:$true] %s146_s2 }
  0x10   :  { %v77_v6 = vsel %vm60_vm0, %v76_v2, 0.0  ;;  %v69_v7 = vsel %vm60_vm0, %v68_v3, 0.0  ;;  %v65_v8 = vsel %vm60_vm0, %v64_v4, 0.0 }
  0x11   :  { %78 = vadd.xlane.f32.xlu1 %v77_v6  ;;  %70 = vadd.xlane.f32.xlu0 %v69_v7  ;;  %v73_v11 = vsel %vm60_vm0, %v72_v9, 0.0  ;;  %v61_v12 = vsel %vm60_vm0, %v59_v10, 0.0 }
  0x12   :  { %66 = vadd.xlane.f32.xlu2 %v65_v8 }
  0x19   :  { %74 = vadd.xlane.f32.xlu0 %v73_v11  ;;  %62 = vadd.xlane.f32.xlu1 %v61_v12 }
  0x84   :  { %v79_v13 = vpop.xlane.xlu1 %78  ;;  %v71_v14 = vpop.xlane.xlu0 %70 }
  0x85   :  { %v102_v15 = vmax.f32 %v79_v13, 1e-16  ;;  %v80_v16 = vmax.f32 %v71_v14, 1e-16  ;;  %v67_v35 = vpop.xlane.xlu2 %66 }
  0x87   :  { %165 = vrsqrt.f32 %v102_v15  ;;  %vm87_vm2 = vweird.f32 %v80_v16  ;;  %vm109_vm4 = vweird.f32 %v102_v15 }
  0x88   :  { %167 = vrsqrt.f32 %v80_v16 }
  0x8c   :  { %v75_v17 = vpop.xlane.xlu0 %74  ;;  %v63_v38 = vpop.xlane.xlu1 %62 }
  0x8d   :  { %v166_v18 = vpop.eup %165  ;;  %v91_v19 = vmax.f32 %v75_v17, 1e-16 }
  0x8e   :  { %v168_v20 = vpop.eup %167  ;;  %v104_v21 = vmul.f32 %v166_v18, %v102_v15  ;;  %vm110_vm5 = vweird.f32 %v166_v18 }
  0x8f   :  { %v82_v22 = vmul.f32 %v168_v20, %v80_v16  ;;  %169 = vrsqrt.f32 %v91_v19  ;;  %vm88_vm1 = vweird.f32 %v168_v20  ;;  %vm98_vm7 = vweird.f32 %v91_v19  ;;  %vm111_vm8 = vmor %vm109_vm4, %vm110_vm5 }
  0x90   :  { %v105_v23 = vmul.f32 %v166_v18, %v104_v21  ;;  %vm89_vm3 = vmor %vm87_vm2, %vm88_vm1 }
  0x91   :  { %v83_v24 = vmul.f32 %v168_v20, %v82_v22 }
  0x92   :  { %v106_v26 = vmul.f32 0.5, %v105_v23 }
  0x93   :  { %v84_v25 = vmul.f32 0.5, %v83_v24 }
  0x94   :  { %v107_v31 = vsub.f32 1.5, %v106_v26 }
  0x95   :  { %v170_v27 = vpop.eup %169  ;;  %v85_v28 = vsub.f32 1.5, %v84_v25 }
  0x96   :  { %v93_v29 = vmul.f32 %v170_v27, %v91_v19  ;;  %vm99_vm6 = vweird.f32 %v170_v27  ;;  %v108_v37 = vmul.f32 %v166_v18, %v107_v31 }
  0x97   :  { %v86_v30 = vmul.f32 %v168_v20, %v85_v28  ;;  %vm100_vm9 = vmor %vm98_vm7, %vm99_vm6 }
  0x98   :  { %v94_v32 = vmul.f32 %v170_v27, %v93_v29  ;;  %v112_v42 = vsel %vm111_vm8, %v166_v18, %v108_v37 }
  0x99   :  { %v90_v34 = vsel %vm89_vm3, %v168_v20, %v86_v30 }
  0x9a   :  { %v95_v33 = vmul.f32 0.5, %v94_v32  ;;  %v115_v39 = vmul.f32 %v90_v34, %v67_v35  ;;  %v113_v41 = vmul.f32 %v90_v34, %v63_v38 }
  0x9c   :  { %v96_v36 = vsub.f32 1.5, %v95_v33  ;;  %v116_v44 = vmul.f32 %v115_v39, %v112_v42 }
  0x9e   :  { %v97_v40 = vmul.f32 %v170_v27, %v96_v36 }
  0xa0   :  { %v101_v43 = vsel %vm100_vm9, %v170_v27, %v97_v40 }
  0xa1   :  { %v114_v45 = vmul.f32 %v113_v41, %v101_v43 }
  0xa3   :  { %v117_v46 = vsub.f32 %v114_v45, %v116_v44 }
  0xa5   :  { %v118_v47 = vsub.f32 0.5, %v117_v46 }
  0xa7   :  { %v119_v48 = vmax.f32 %v118_v47, 1e-06 }
  0xa9   :  { %v128_v49 = vsel %vm127_vm10, %v119_v48, 0.0 }
  0xaa   :  { %129 = vadd.xlane.f32.xlu2 %v128_v49 }
 0x11d   :  { %v130_v50 = vpop.xlane.xlu2 %129 }
 0x11e   :  { %v131_v51 = vrot.slane %v130_v50, 4 }
 0x120   :  { %v132_v52 = vadd.f32 %v131_v51, %v130_v50 }
 0x122   :  { %v133_v53 = vrot.slane %v132_v52, 2 }
 0x124   :  { %v134_v54 = vadd.f32 %v133_v53, %v132_v52 }
 0x126   :  { %v135_v55 = vrot.slane %v134_v54, 1 }
 0x128   :  { %v136_v56 = vadd.f32 %v135_v55, %v134_v54 }
 0x12a   :  { %159 = vpush %v136_v56 }
 0x15b   :  { %s160_s29 = spop %159 }
 0x15c   :  { %v138_v57 = vstv %s160_s29 }
 0x15d   :  { %140 = vst.msk [vmem:[#allocation8] sm:$0x1] %vm139_vm11, %v138_v57 }
 0x15e   :  { %151 = dma.vmem_to_hbm [thread:$0]  %s147_s2, 16, %s149_s28, [#allocation4]  }
 0x15f   :  { %271 = dma.done.wait [#allocation4], 16  }
 0x160   :  { %272 = vsyncadd [#allocation4], 4294967280 }
 0x161   :  { %156 = vsyncpa [#allocation3], 1 }
 0x162   :  { %157 = vsyncpa [#allocation6], 1 }
 0x163   :  { %158 = vsyncpa [#allocation4], 1 }

</bundles_post_ra>
